<compile_context>
chip_gen: v5e
topology: v5e:2x2
jax: 0.10.0
libtpu: 0.0.40
codegen_flags: <defaults>
</compile_context>

<pallas_src>
import functools

import jax
import jax.numpy as jnp
import numpy as np
from jax.experimental import pallas as pl
from jax.experimental.pallas import tpu as pltpu


def _blur_matrix_1d(n_in: int, n_out: int, stride: int) -> np.ndarray:
    """(n_out, n_in) operator applying the [1,2,1]/4 blur at `stride` with a
    reflect padding of 1 folded into the boundary entries."""
    taps = (0.25, 0.5, 0.25)
    m = np.zeros((n_out, n_in), dtype=np.float32)
    for i in range(n_out):
        for d, t in enumerate(taps):
            j = stride * i + d - 1            # index into the *unpadded* signal
            if j < 0:                         # reflect:  -1 -> 1
                j = -j
            elif j >= n_in:                   # reflect:   n -> n - 2
                j = 2 * (n_in - 1) - j
            m[i, j] += t
    return m


def _pick_channel_block(nc, h, ho, w, wo, itemsize):
    """Largest channel batch Cb that (a) divides N*C, (b) keeps block shapes
    8-sublane aligned, (c) fits a conservative VMEM budget (v7x-safe), and
    (d) keeps the grid length >= 2 where possible (both v7x TensorCores)."""
    lane = lambda d: ((d + 127) // 128) * 128
    per_chan = (16 * ho * lane(w)                                   # f32 intermediates
                + 2 * itemsize * (h * lane(w) + ho * lane(wo)))     # double-buffered I/O
    cb_cap = max(1, min(256, (12 * 1024 * 1024) // max(per_chan, 1)))
    candidates = [d for d in range(1, nc + 1)
                  if nc % d == 0 and ((d * h) % 16 == 0 or d == nc)]
    pool = [d for d in candidates if d <= cb_cap] or candidates[:1]
    pref = [d for d in pool if nc // d >= 2]
    return max(pref) if pref else max(pool)


def _aa_downsample_kernel(b_ref, x_ref, o_ref, *, out_rows_per_chan):
    """One grid step: Cb channels worth of rows.

    b_ref: (W, Wo)   x_ref: (Cb*H, W)   o_ref: (Cb*Ho, Wo)
    Vertical blur + stride-2 + reflect on the VPU; horizontal blur + stride-2
    + reflect as one large MXU matmul against B.
    """
    m_out = o_ref.shape[0]
    w = x_ref.shape[1]
    f32 = jnp.float32

    xe = x_ref[pl.ds(0, m_out, stride=2), :].astype(f32)   # rows 2i   (center tap)
    xo = x_ref[pl.ds(1, m_out, stride=2), :].astype(f32)   # rows 2i+1 (lower tap)
    # rows 2i-1 (upper tap) == previous odd row; at each channel's first
    # output row the reflect pad maps row -1 back to row 1 (that channel's
    # own first odd row), handled by the mask below.
    prev = jnp.concatenate([xo[:1, :], xo[:-1, :]], axis=0)
    row_in_chan = jax.lax.broadcasted_iota(jnp.int32, (m_out, w), 0) % out_rows_per_chan
    prev = jnp.where(row_in_chan == 0, xo, prev)

    v = 0.5 * xe + 0.25 * xo + 0.25 * prev                  # (Cb*Ho, W), VPU
    y = jnp.dot(v.astype(b_ref.dtype), b_ref[...],
                preferred_element_type=jnp.float32)          # (Cb*Ho, Wo), MXU
    o_ref[...] = y.astype(o_ref.dtype)


def anti_alias_downsample(x, stride: int = 2, filt_size: int = 3):
    """x: (N, C, H, W) -> (N, C, H//2, W_out); matches Downsample/DownsampleJIT
    forward (3x3 [1,2,1]x[1,2,1]/16 depthwise blur, stride 2, reflect pad 1)."""
    assert filt_size == 3
    assert stride == 2                      # the JIT module asserts stride == 2
    n, c, h, w = x.shape
    assert h >= 2 and w >= 2
    # TODO(synk): odd input height would need a bottom-reflect fix-up path;
    # TResNet only ever feeds even spatial sizes to this layer.
    assert h % 2 == 0

    ho = (h - 1) // stride + 1              # == (H+2-3)//stride + 1
    wo = (w - 1) // stride + 1
    nc = n * c

    filt_dtype = jnp.bfloat16 if x.dtype == jnp.bfloat16 else jnp.float32
    b = jnp.asarray(_blur_matrix_1d(w, wo, stride).T, dtype=filt_dtype)   # (W, Wo)

    cb = _pick_channel_block(nc, h, ho, w, wo, x.dtype.itemsize)
    grid = (nc // cb,)

    x2d = x.reshape(nc * h, w)              # free view of contiguous NCHW, no pad pass

    kernel = functools.partial(_aa_downsample_kernel, out_rows_per_chan=ho)
    out2d = pl.pallas_call(
        kernel,
        out_shape=jax.ShapeDtypeStruct((nc * ho, wo), x.dtype),
        grid_spec=pltpu.PrefetchScalarGridSpec(
            num_scalar_prefetch=0,
            grid=grid,
            in_specs=[
                pl.BlockSpec((w, wo), lambda i: (0, 0)),        # B: tiny, stays resident
                pl.BlockSpec((cb * h, w), lambda i: (i, 0)),    # Cb channels per step
            ],
            out_specs=pl.BlockSpec((cb * ho, wo), lambda i: (i, 0)),
        ),
        compiler_params=pltpu.CompilerParams(
            dimension_semantics=("parallel",),
            vmem_limit_bytes=32 * 1024 * 1024,
        ),
    )(b, x2d)
    return out2d.reshape(n, c, ho, wo)


def _reference_downsample(x, stride=2):
    """Pure-JAX reference: grouped conv2d with the same 3x3 blur filter."""
    n, c, h, w = x.shape
    a = jnp.array([1.0, 2.0, 1.0], dtype=jnp.float32)
    filt2d = a[:, None] * a[None, :]
    filt2d = filt2d / jnp.sum(filt2d)
    filt = jnp.broadcast_to(filt2d, (c, 1, 3, 3)).astype(x.dtype)
    x_pad = jnp.pad(x, ((0, 0), (0, 0), (1, 1), (1, 1)), mode="reflect")
    return jax.lax.conv_general_dilated(
        x_pad, filt,
        window_strides=(stride, stride),
        padding="VALID",
        dimension_numbers=("NCHW", "OIHW", "NCHW"),
        feature_group_count=c,
    )


if __name__ == "__main__":
    key = jax.random.PRNGKey(0)
    N, C, H, W = 2, 4, 16, 16
    x = jax.random.normal(key, (N, C, H, W), dtype=jnp.float32)

    y = anti_alias_downsample(x)
    y = jax.block_until_ready(y)

    y_ref = _reference_downsample(x)
    assert y.shape == y_ref.shape == (N, C, H // 2, W // 2), (y.shape, y_ref.shape)
    assert jnp.allclose(y, y_ref, rtol=1e-5, atol=1e-5), float(
        jnp.max(jnp.abs(y - y_ref)))

    print("KERNEL_OK")
</pallas_src>

<mosaic_0001>
module attributes {stable_mosaic.version = 11 : i64} {
  func.func @_aa_downsample_kernel(%arg0: i32, %arg1: memref<16x8xf32, #tpu.memory_space<vmem>>, %arg2: memref<64x16xf32, #tpu.memory_space<vmem>>, %arg3: memref<32x8xf32, #tpu.memory_space<vmem>>) attributes {dimension_semantics = [#tpu.dimension_semantics<parallel>], iteration_bounds = array<i64: 2>, scalar_prefetch = 0 : i64, scratch_operands = 0 : i64, tpu.core_type = #tpu.core_type<tc>, window_params = [{pipeline_mode = #tpu.pipeline_mode<synchronous>, transform_indices = @transform_0, window_bounds = array<i64: 16, 8>}, {transform_indices = @transform_1, window_bounds = array<i64: 64, 16>}, {transform_indices = @transform_2, window_bounds = array<i64: 32, 8>}]} {
    %c0 = arith.constant 0 : index
    %c0_0 = arith.constant 0 : index
    %0 = tpu.strided_load %arg2[%c0, %c0_0] {strides = array<i32: 2, 1>} : memref<64x16xf32, #tpu.memory_space<vmem>>, vector<32x16xf32>
    %c1 = arith.constant 1 : index
    %c0_1 = arith.constant 0 : index
    %1 = tpu.strided_load %arg2[%c1, %c0_1] {strides = array<i32: 2, 1>} : memref<64x16xf32, #tpu.memory_space<vmem>>, vector<32x16xf32>
    %2 = vector.extract_strided_slice %1 {offsets = [0, 0], sizes = [1, 16], strides = [1, 1]} : vector<32x16xf32> to vector<1x16xf32>
    %3 = vector.extract_strided_slice %1 {offsets = [0, 0], sizes = [31, 16], strides = [1, 1]} : vector<32x16xf32> to vector<31x16xf32>
    %4 = tpu.concatenate %2, %3 in 0 : vector<1x16xf32>, vector<31x16xf32> -> vector<32x16xf32>
    %5 = tpu.iota {dimensions = array<i32: 0>} : vector<32x16xi32>
    %c8_i32 = arith.constant 8 : i32
    %c0_i32 = arith.constant 0 : i32
    %6 = arith.cmpi eq, %c8_i32, %c0_i32 : i32
    %c1_i32 = arith.constant 1 : i32
    %7 = arith.select %6, %c1_i32, %c8_i32 : i32
    %8 = vector.broadcast %7 : i32 to vector<32x16xi32>
    %9 = arith.remsi %5, %8 : vector<32x16xi32>
    %c0_i32_2 = arith.constant 0 : i32
    %10 = vector.broadcast %c0_i32_2 : i32 to vector<32x16xi32>
    %11 = arith.cmpi ne, %9, %10 : vector<32x16xi32>
    %c0_i32_3 = arith.constant 0 : i32
    %12 = vector.broadcast %c0_i32_3 : i32 to vector<32x16xi32>
    %13 = arith.cmpi slt, %9, %12 : vector<32x16xi32>
    %c0_i32_4 = arith.constant 0 : i32
    %14 = arith.cmpi slt, %7, %c0_i32_4 : i32
    %15 = vector.broadcast %14 : i1 to vector<32x16xi1>
    %16 = vector.broadcast %15 : vector<32x16xi1> to vector<32x16xi1>
    %17 = arith.xori %13, %16 : vector<32x16xi1>
    %18 = arith.andi %17, %11 : vector<32x16xi1>
    %19 = vector.broadcast %7 : i32 to vector<32x16xi32>
    %20 = arith.addi %9, %19 : vector<32x16xi32>
    %21 = arith.select %18, %20, %9 : vector<32x16xi1>, vector<32x16xi32>
    %c0_i32_5 = arith.constant 0 : i32
    %22 = vector.broadcast %c0_i32_5 : i32 to vector<32x16xi32>
    %23 = arith.cmpi eq, %21, %22 : vector<32x16xi32>
    %24 = arith.select %23, %1, %4 : vector<32x16xi1>, vector<32x16xf32>
    %cst = arith.constant 5.000000e-01 : f32
    %25 = vector.broadcast %cst : f32 to vector<32x16xf32>
    %26 = arith.mulf %25, %0 : vector<32x16xf32>
    %cst_6 = arith.constant 2.500000e-01 : f32
    %27 = vector.broadcast %cst_6 : f32 to vector<32x16xf32>
    %28 = arith.mulf %27, %1 : vector<32x16xf32>
    %29 = arith.addf %26, %28 : vector<32x16xf32>
    %cst_7 = arith.constant 2.500000e-01 : f32
    %30 = vector.broadcast %cst_7 : f32 to vector<32x16xf32>
    %31 = arith.mulf %30, %24 : vector<32x16xf32>
    %32 = arith.addf %29, %31 : vector<32x16xf32>
    %c0_8 = arith.constant 0 : index
    %c0_9 = arith.constant 0 : index
    %33 = vector.load %arg1[%c0_8, %c0_9] : memref<16x8xf32, #tpu.memory_space<vmem>>, vector<16x8xf32>
    %cst_10 = arith.constant dense<0.000000e+00> : vector<32x8xf32>
    %34 = tpu.matmul %32, %33, %cst_10 {dimension_numbers = #tpu.dot_dimension_numbers<[1], [0], [0], [1], [0, 0, 1, 1], [], []>} : vector<32x16xf32>, vector<16x8xf32>, vector<32x8xf32> -> vector<32x8xf32>
    %c0_11 = arith.constant 0 : index
    %c0_12 = arith.constant 0 : index
    %35 = vector.load %arg3[%c0_11, %c0_12] : memref<32x8xf32, #tpu.memory_space<vmem>>, vector<32x8xf32>
    tpu.vector_store %arg3[%c0_11, %c0_12], %34 {strides = array<i32>} : memref<32x8xf32, #tpu.memory_space<vmem>>, vector<32x8xf32>,
    return
  }
  func.func @transform_0(%arg0: i32) -> (i32, i32) {
    %c0_i32 = arith.constant 0 : i32
    %c0_i32_0 = arith.constant 0 : i32
    %c0_i32_1 = arith.constant 0 : i32
    return %c0_i32, %c0_i32_0 : i32, i32
  }
  func.func @transform_1(%arg0: i32) -> (i32, i32) {
    %c0_i32 = arith.constant 0 : i32
    %c0_i32_0 = arith.constant 0 : i32
    return %arg0, %c0_i32 : i32, i32
  }
  func.func @transform_2(%arg0: i32) -> (i32, i32) {
    %c0_i32 = arith.constant 0 : i32
    %c0_i32_0 = arith.constant 0 : i32
    return %arg0, %c0_i32 : i32, i32
  }
}

</mosaic_0001>

<bundles_post_ra>
// kernel: tpu_custom_call.1
= control target key start
LH: loop header
LB: loop body
LE: loop exit
PB: predicated region body
PF: predicated region fallthrough
CT: control target
= control target key end

     0   :  { %s424_s9 = smov 0   ;;  %s483_s0 = inlined_call_operand.vmem [shape: f32[16,8], index: 0, kind: input, shape index: {}]   ;;  %s484_s1 = inlined_call_operand.vmem [shape: f32[128,16], index: 1, kind: input, shape index: {}]   ;;  %s485_s2 = inlined_call_operand.vmem [shape: f32[64,8], index: 2, kind: output, shape index: {}]  }
   0x1 LB: > { %s365_s10 = sadd.s32 4294967295, %s407_s9   ;;  %p369_p0 = scmp.ge.s32.totalorder %s407_s9, 1  ;;  %s407_s9 = sphi %s424_s9, %s12_s9  }
   0x2   : > { %p113_p1 = scmp.lt.s32.totalorder %s407_s9, 3 }
   0x4   : > { %p114_p2 = pnand %p369_p0, %p113_p1 }
   0x5   : > { %s370_s15 = sshll.u32 (!%p114_p2), %s365_s10, 3  ;;  %s372_s20 = sshll.u32 (!%p114_p2), %s365_s10, 2 }
   0x6   : > { %117 = sbr.rel (%p114_p2) target bundleno = 159 (0x9f), region = 28  ;;  %p136_p3 = scmp.lt.s32.totalorder (!%p114_p2), %s370_s15, 15 }
   0x7   : > { %p142_p4 = scmp.lt.s32.totalorder (!%p114_p2), %s372_s20, 7 }
   0xb   : > { %v261_v0 = vld [vmem:[%s483_s0 + $0x8] sm:$0xff]  ;;  %v260_v1 = vld [vmem:[%s483_s0] sm:$0xff]  ;;  %v179_v2 = vlaneseq  ;;  %s495_s15 = smov (!%p136_p3, %s370_s15), 15  ;;  %vm166_vm0 = vcmask 1040384   ;;  %vm262_vm1 = vcmask 130048   ;;  %s497_s20 = smov (!%p142_p4, %s372_s20), 7 }
   0xc   : > { %388 = vmatpush.msra.mxu2 %v261_v0  ;;  %389 = vmatpush.msra.mxu3 %v261_v0  ;;  %s371_s16 = sshll.u32 %s495_s15, 3  ;;  %s373_s21 = sshll.u32 %s497_s20, 3  ;;  %vm304_vm6 = vcmask 64512  }
   0xd   : > { %v180_v3 = vshrl.u32 %v179_v2, 7  ;;  %289 = vmatpush.msra.mxu0 %v261_v0  ;;  %387 = vmatpush.msra.mxu1 %v261_v0  ;;  %s139_s19 = scalar_lea.vmem %s484_s1, %s371_s16  ;;  %s145_s24 = scalar_lea.vmem %s485_s2, %s373_s21 }
   0xe   : > { %391 = vmatpush.msra.mxu2 %v260_v1  ;;  %392 = vmatpush.msra.mxu3 %v260_v1  ;;  %v375_v12 = vld [vmem:[%s139_s19 + $0x20] ss:$2 sm:$0xff]  ;;  %v378_v13 = vld [vmem:[%s139_s19 + $0x11] ss:$2 sm:$0xff]  ;;  %v379_v14 = vld [vmem:[%s139_s19 + $0x21] ss:$2 sm:$0xff] }
   0xf   : > { %v182_v4 = vadd.s32 16, %v180_v3  ;;  %v183_v5 = vadd.s32 24, %v180_v3  ;;  %290 = vmatpush.msra.mxu0 %v260_v1  ;;  %390 = vmatpush.msra.mxu1 %v260_v1  ;;  %v188_v6 = vand.u32 7, %v180_v3  ;;  %v181_v7 = vadd.s32 8, %v180_v3  ;;  %v376_v19 = vld [vmem:[%s139_s19 + $0x30] ss:$2 sm:$0xff] }
  0x10   : > { %v168_v15 = vrot.slane %v378_v13, 7  ;;  %v170_v16 = vrot.slane %v379_v14, 7  ;;  %v242_v18 = vmul.f32 0.5, %v375_v12  ;;  %v246_v20 = vmul.f32 0.25, %v379_v14  ;;  %v380_v21 = vld [vmem:[%s139_s19 + $0x31] ss:$2 sm:$0xff] }
  0x11   : > { %v202_v8 = vand.u32 7, %v182_v4  ;;  %v209_v9 = vand.u32 7, %v183_v5  ;;  %vm443_vm2 = vcmp.eq.s32.totalorder %v188_v6, 0  ;;  %v195_v11 = vand.u32 7, %v181_v7  ;;  %v147_v28 = vld [vmem:[%s139_s19] ss:$2 sm:$0xff] }
  0x12   : > { %v243_v23 = vmul.f32 0.5, %v376_v19  ;;  %v171_v25 = vsel %vm166_vm0, %v168_v15, %v170_v16  ;;  %v172_v26 = vrot.slane %v380_v21, 7  ;;  %v247_v27 = vmul.f32 0.25, %v380_v21  ;;  %v377_v29 = vld [vmem:[%s139_s19 + $0x1] ss:$2 sm:$0xff] }
  0x13   : > { %vm447_vm3 = vcmp.eq.s32.totalorder %v202_v8, 0  ;;  %vm451_vm4 = vcmp.eq.s32.totalorder %v209_v9, 0  ;;  %vm455_vm5 = vcmp.eq.s32.totalorder %v195_v11, 0  ;;  %v250_v31 = vadd.f32 %v246_v20, %v242_v18  ;;  %v374_v34 = vld [vmem:[%s139_s19 + $0x10] ss:$2 sm:$0xff] }
  0x14   : > { %v238_v30 = vsel %vm447_vm3, %v379_v14, %v171_v25  ;;  %v167_v32 = vrot.slane %v377_v29, 7  ;;  %v240_v33 = vmul.f32 0.5, %v147_v28  ;;  %v173_v36 = vsel %vm166_vm0, %v170_v16, %v172_v26 }
  0x15   : > { %v254_v35 = vmul.f32 0.25, %v238_v30  ;;  %v251_v37 = vadd.f32 %v247_v27, %v243_v23  ;;  %v244_v38 = vmul.f32 0.25, %v377_v29  ;;  %v239_v39 = vsel %vm451_vm4, %v380_v21, %v173_v36 }
  0x16   : > { %v178_v40 = vsel %vm166_vm0, %v377_v29, %v167_v32  ;;  %v169_v41 = vsel %vm166_vm0, %v167_v32, %v168_v15  ;;  %v241_v42 = vmul.f32 0.5, %v374_v34  ;;  %v255_v44 = vmul.f32 0.25, %v239_v39 }
  0x17   : > { %v258_v43 = vadd.f32 %v254_v35, %v250_v31  ;;  %v236_v45 = vsel %vm443_vm2, %v377_v29, %v178_v40  ;;  %v248_v46 = vadd.f32 %v244_v38, %v240_v33  ;;  %v237_v48 = vsel %vm455_vm5, %v378_v13, %v169_v41 }
  0x18   : > { %v252_v47 = vmul.f32 0.25, %v236_v45  ;;  %v245_v49 = vmul.f32 0.25, %v378_v13  ;;  %v259_v50 = vadd.f32 %v255_v44, %v251_v37  ;;  %v253_v51 = vmul.f32 0.25, %v237_v48 }
  0x19   : > { %383 = vmatmul.msk.f32.vlgmr.msra.gmra.mxu2 %vm262_vm1, %v258_v43 }
  0x1a   : > { %v256_v52 = vadd.f32 %v252_v47, %v248_v46  ;;  %v249_v53 = vadd.f32 %v245_v49, %v241_v42  ;;  %384 = vmatmul.msk.f32.vlgmr.msra.gmra.mxu3 %vm262_vm1, %v259_v50 }
  0x1c   : > { %381 = vmatmul.msk.f32.vlgmr.msra.gmra.mxu0 %vm262_vm1, %v256_v52  ;;  %v257_v54 = vadd.f32 %v253_v51, %v249_v53 }
  0x1e   : > { %382 = vmatmul.msk.f32.vlgmr.msra.gmra.mxu1 %vm262_vm1, %v257_v54 }
  0x99   : > { %v292_v55 = vpop.f32.mrf.mxu0 }
  0x9a   : > { %305 = vst.msk [vmem:[%s145_s24] sm:$0xff] %vm304_vm6, %v292_v55 }
  0x9b   : > { %v295_v56 = vpop.f32.mrf.mxu1 }
  0x9c   : > { %306 = vst.msk [vmem:[%s145_s24 + $0x8] sm:$0xff] %vm304_vm6, %v295_v56  ;;  %v298_v57 = vpop.f32.mrf.mxu2 }
  0x9d   : > { %307 = vst.msk [vmem:[%s145_s24 + $0x10] sm:$0xff] %vm304_vm6, %v298_v57  ;;  %v301_v58 = vpop.f32.mrf.mxu3 }
  0x9e   : > { %308 = vst.msk [vmem:[%s145_s24 + $0x18] sm:$0xff] %vm304_vm6, %v301_v58 }
  0x9f PF: > { %s12_s9 = sadd.s32 1, %s407_s9  }
  0xa0   : > { %p9_p5 = scmp.ge.s32.totalorder %s12_s9, 4  }
  0xa2   :  { %11 = sbr.rel (!%p9_p5) target bundleno = 1 (0x1), region = 65 }

</bundles_post_ra>
